<compile_context>
chip_gen: v7x
topology: tpu7x:2x2x1
jax: 0.10.0
libtpu: 0.0.40
codegen_flags: <defaults>
</compile_context>

<pallas_src>
import math
import functools

import jax
import jax.numpy as jnp
from jax.experimental import pallas as pl
from jax.experimental.pallas import tpu as pltpu

# ---- config (small, deterministic, consistent with the module) --------------
BATCH = 2
SEQ = 8
HIDDEN = 32
NUM_HEADS = 4
HEAD_DIM = HIDDEN // NUM_HEADS
INTERMEDIATE = 64
LN_EPS = 1e-12


def _layer_norm(x, gamma, beta, eps):
    # x: (N, H); gamma/beta: (1, H)
    mean = jnp.mean(x, axis=-1, keepdims=True)
    cent = x - mean
    var = jnp.mean(cent * cent, axis=-1, keepdims=True)
    inv = jax.lax.rsqrt(var + eps)
    return cent * inv * gamma + beta


def _gelu(x):
    # TODO(synk): tanh-approx GELU; PyTorch nn.GELU default is exact erf.
    c = math.sqrt(2.0 / math.pi)
    return 0.5 * x * (1.0 + jnp.tanh(c * (x + 0.044715 * x * x * x)))


def encoder_layer_kernel(
    x_ref, mask_ref,
    ln1_g_ref, ln1_b_ref,
    wqkv_ref, bqkv_ref, wo_ref, bo_ref,
    ln2_g_ref, ln2_b_ref,
    w1_ref, b1_ref, w2_ref, b2_ref,
    out_ref,
    *, batch, seq, hidden, num_heads, head_dim,
):
    x = x_ref[...]                                   # (B*S, H) flattened tokens
    add_mask = (1.0 - mask_ref[...]) * -10000.0      # (B, S) additive key mask

    # ---------------- block 1: pre-LN + fused-QKV MHA + residual -------------
    residual = x
    h = _layer_norm(x, ln1_g_ref[...], ln1_b_ref[...], LN_EPS)

    # one fused projection: (B*S, H) @ (H, 3H) -> (B*S, 3H)
    qkv = jnp.dot(h, wqkv_ref[...], preferred_element_type=jnp.float32) + bqkv_ref[...]

    # split back to per-batch only for score/softmax (mask is per-batch)
    qkv3 = qkv.reshape(batch, seq, 3 * hidden)
    scale = 1.0 / math.sqrt(head_dim)
    q = qkv3[:, :, 0:hidden] * scale                 # fold 1/sqrt(d) into Q once
    k = qkv3[:, :, hidden:2 * hidden]
    v = qkv3[:, :, 2 * hidden:3 * hidden]

    key_bias = add_mask[:, None, :]                  # (B, 1, S) broadcast over q rows
    head_outs = []
    for hd_i in range(num_heads):                    # unrolled (4 heads), tiny tiles
        lo = hd_i * head_dim
        q_h = q[:, :, lo:lo + head_dim]              # (B, S, d)
        k_h = k[:, :, lo:lo + head_dim]              # (B, S, d)
        v_h = v[:, :, lo:lo + head_dim]              # (B, S, d)
        # contraction over d on both operands -> no explicit k.T transpose
        s_h = jnp.einsum('bqd,bkd->bqk', q_h, k_h,
                         preferred_element_type=jnp.float32)
        s_h = s_h + key_bias
        m = jnp.max(s_h, axis=-1, keepdims=True)
        p = jnp.exp(s_h - m)
        denom = jnp.sum(p, axis=-1, keepdims=True)
        p = p * pl.reciprocal(denom, approx=True)    # EUP slot, nearly free
        # attention dropout is identity in eval mode
        head_outs.append(jnp.einsum('bqk,bkd->bqd', p, v_h,
                                    preferred_element_type=jnp.float32))
    context = jnp.concatenate(head_outs, axis=-1).reshape(batch * seq, hidden)

    attn_out = jnp.dot(context, wo_ref[...],
                       preferred_element_type=jnp.float32) + bo_ref[...]
    x1 = residual + attn_out          # hidden dropout is identity (eval mode)

    # ---------------- block 2: pre-LN + feed-forward + residual --------------
    residual = x1
    h2 = _layer_norm(x1, ln2_g_ref[...], ln2_b_ref[...], LN_EPS)
    ff = jnp.dot(h2, w1_ref[...], preferred_element_type=jnp.float32) + b1_ref[...]
    ff = _gelu(ff)
    ff = jnp.dot(ff, w2_ref[...], preferred_element_type=jnp.float32) + b2_ref[...]
    out_ref[...] = residual + ff      # hidden dropout is identity (eval mode)


@jax.jit
def transformer_encoder_layer(x, attention_mask, params):
    B, S, H = x.shape

    # Fuse Q/K/V projections into a single weight (constant-folded under jit).
    wqkv = jnp.concatenate([params["wq"], params["wk"], params["wv"]], axis=1)  # (H, 3H)
    bqkv = jnp.concatenate([params["bq"], params["bk"], params["bv"]], axis=1)  # (1, 3H)

    # Flatten the token axis so every matmul sees B*S rows in one shot.
    x2d = x.reshape(B * S, H)
    mask2d = attention_mask.reshape(B, S).astype(x.dtype)

    kernel = functools.partial(
        encoder_layer_kernel,
        batch=B, seq=S, hidden=H, num_heads=NUM_HEADS, head_dim=HEAD_DIM,
    )

    vmem_spec = pl.BlockSpec(memory_space=pltpu.MemorySpace.VMEM)

    out2d = pl.pallas_call(
        kernel,
        out_shape=jax.ShapeDtypeStruct((B * S, H), x.dtype),
        # No grid: single invocation, every operand is one full VMEM block.
        in_specs=[vmem_spec] * 14,
        out_specs=vmem_spec,
    )(
        x2d, mask2d,
        params["ln1_g"], params["ln1_b"],
        wqkv, bqkv,
        params["wo"], params["bo"],
        params["ln2_g"], params["ln2_b"],
        params["w1"], params["b1"], params["w2"], params["b2"],
    )
    return out2d.reshape(B, S, H)


def init_params(key):
    keys = jax.random.split(key, 8)

    def lin(k, din, dout):
        w = jax.random.normal(k, (din, dout), jnp.float32) * (1.0 / math.sqrt(din))
        b = jnp.zeros((1, dout), jnp.float32)
        return w, b

    wq, bq = lin(keys[0], HIDDEN, HIDDEN)
    wk, bk = lin(keys[1], HIDDEN, HIDDEN)
    wv, bv = lin(keys[2], HIDDEN, HIDDEN)
    wo, bo = lin(keys[3], HIDDEN, HIDDEN)
    w1, b1 = lin(keys[4], HIDDEN, INTERMEDIATE)
    w2, b2 = lin(keys[5], INTERMEDIATE, HIDDEN)
    return dict(
        ln1_g=jnp.ones((1, HIDDEN), jnp.float32),
        ln1_b=jnp.zeros((1, HIDDEN), jnp.float32),
        ln2_g=jnp.ones((1, HIDDEN), jnp.float32),
        ln2_b=jnp.zeros((1, HIDDEN), jnp.float32),
        wq=wq, bq=bq, wk=wk, bk=bk, wv=wv, bv=bv, wo=wo, bo=bo,
        w1=w1, b1=b1, w2=w2, b2=b2,
    )


if __name__ == "__main__":
    key = jax.random.PRNGKey(0)
    kx, kp = jax.random.split(key)
    x = jax.random.normal(kx, (BATCH, SEQ, HIDDEN), jnp.float32)
    # last two key positions of batch 1 are masked out
    attention_mask = jnp.ones((BATCH, 1, SEQ), jnp.float32)
    attention_mask = attention_mask.at[1, 0, -2:].set(0.0)

    params = init_params(kp)

    out = transformer_encoder_layer(x, attention_mask, params)
    out = jax.block_until_ready(out)

    assert out.shape == (BATCH, SEQ, HIDDEN)
    assert bool(jnp.all(jnp.isfinite(out)))
    print("KERNEL_OK")
</pallas_src>

<mosaic_0001>
module attributes {stable_mosaic.version = 11 : i64} {
  func.func @encoder_layer_kernel(%arg0: memref<16x32xf32, #tpu.memory_space<vmem>>, %arg1: memref<2x8xf32, #tpu.memory_space<vmem>>, %arg2: memref<1x32xf32, #tpu.memory_space<vmem>>, %arg3: memref<1x32xf32, #tpu.memory_space<vmem>>, %arg4: memref<32x96xf32, #tpu.memory_space<vmem>>, %arg5: memref<1x96xf32, #tpu.memory_space<vmem>>, %arg6: memref<32x32xf32, #tpu.memory_space<vmem>>, %arg7: memref<1x32xf32, #tpu.memory_space<vmem>>, %arg8: memref<1x32xf32, #tpu.memory_space<vmem>>, %arg9: memref<1x32xf32, #tpu.memory_space<vmem>>, %arg10: memref<32x64xf32, #tpu.memory_space<vmem>>, %arg11: memref<1x64xf32, #tpu.memory_space<vmem>>, %arg12: memref<64x32xf32, #tpu.memory_space<vmem>>, %arg13: memref<1x32xf32, #tpu.memory_space<vmem>>, %arg14: memref<16x32xf32, #tpu.memory_space<vmem>>) attributes {dimension_semantics = [], scalar_prefetch = 0 : i64, scratch_operands = 0 : i64, tpu.core_type = #tpu.core_type<tc>} {
    %c0 = arith.constant 0 : index
    %c0_0 = arith.constant 0 : index
    %0 = vector.load %arg0[%c0, %c0_0] : memref<16x32xf32, #tpu.memory_space<vmem>>, vector<16x32xf32>
    %c0_1 = arith.constant 0 : index
    %c0_2 = arith.constant 0 : index
    %1 = vector.load %arg1[%c0_1, %c0_2] : memref<2x8xf32, #tpu.memory_space<vmem>>, vector<2x8xf32>
    %cst = arith.constant 1.000000e+00 : f32
    %2 = vector.broadcast %cst : f32 to vector<2x8xf32>
    %3 = arith.subf %2, %1 : vector<2x8xf32>
    %cst_3 = arith.constant -1.000000e+04 : f32
    %4 = vector.broadcast %cst_3 : f32 to vector<2x8xf32>
    %5 = arith.mulf %3, %4 : vector<2x8xf32>
    %c0_4 = arith.constant 0 : index
    %c0_5 = arith.constant 0 : index
    %6 = vector.load %arg2[%c0_4, %c0_5] : memref<1x32xf32, #tpu.memory_space<vmem>>, vector<1x32xf32>
    %c0_6 = arith.constant 0 : index
    %c0_7 = arith.constant 0 : index
    %7 = vector.load %arg3[%c0_6, %c0_7] : memref<1x32xf32, #tpu.memory_space<vmem>>, vector<1x32xf32>
    %cst_8 = arith.constant dense<0.000000e+00> : vector<16xf32>
    %8 = vector.multi_reduction <add>, %0, %cst_8 [1] : vector<16x32xf32> to vector<16xf32>
    %9 = vector.shape_cast %8 : vector<16xf32> to vector<16x1xf32>
    %cst_9 = arith.constant 3.200000e+01 : f32
    %10 = vector.broadcast %cst_9 : f32 to vector<16x1xf32>
    %11 = arith.divf %9, %10 : vector<16x1xf32>
    %12 = vector.broadcast %11 : vector<16x1xf32> to vector<16x32xf32>
    %13 = arith.subf %0, %12 : vector<16x32xf32>
    %14 = arith.mulf %13, %13 : vector<16x32xf32>
    %cst_10 = arith.constant dense<0.000000e+00> : vector<16xf32>
    %15 = vector.multi_reduction <add>, %14, %cst_10 [1] : vector<16x32xf32> to vector<16xf32>
    %16 = vector.shape_cast %15 : vector<16xf32> to vector<16x1xf32>
    %cst_11 = arith.constant 3.200000e+01 : f32
    %17 = vector.broadcast %cst_11 : f32 to vector<16x1xf32>
    %18 = arith.divf %16, %17 : vector<16x1xf32>
    %cst_12 = arith.constant 9.99999996E-13 : f32
    %19 = vector.broadcast %cst_12 : f32 to vector<16x1xf32>
    %20 = arith.addf %18, %19 : vector<16x1xf32>
    %21 = math.rsqrt %20 : vector<16x1xf32>
    %22 = vector.broadcast %21 : vector<16x1xf32> to vector<16x32xf32>
    %23 = arith.mulf %13, %22 : vector<16x32xf32>
    %24 = vector.broadcast %6 : vector<1x32xf32> to vector<16x32xf32>
    %25 = arith.mulf %23, %24 : vector<16x32xf32>
    %26 = vector.broadcast %7 : vector<1x32xf32> to vector<16x32xf32>
    %27 = arith.addf %25, %26 : vector<16x32xf32>
    %c0_13 = arith.constant 0 : index
    %c0_14 = arith.constant 0 : index
    %28 = vector.load %arg4[%c0_13, %c0_14] : memref<32x96xf32, #tpu.memory_space<vmem>>, vector<32x96xf32>
    %cst_15 = arith.constant dense<0.000000e+00> : vector<16x96xf32>
    %29 = tpu.matmul %27, %28, %cst_15 {dimension_numbers = #tpu.dot_dimension_numbers<[1], [0], [0], [1], [0, 0, 1, 1], [], []>} : vector<16x32xf32>, vector<32x96xf32>, vector<16x96xf32> -> vector<16x96xf32>
    %c0_16 = arith.constant 0 : index
    %c0_17 = arith.constant 0 : index
    %30 = vector.load %arg5[%c0_16, %c0_17] : memref<1x96xf32, #tpu.memory_space<vmem>>, vector<1x96xf32>
    %31 = vector.broadcast %30 : vector<1x96xf32> to vector<16x96xf32>
    %32 = arith.addf %29, %31 : vector<16x96xf32>
    %33 = vector.shape_cast %32 : vector<16x96xf32> to vector<2x8x96xf32>
    %34 = vector.extract_strided_slice %33 {offsets = [0, 0, 0], sizes = [2, 8, 32], strides = [1, 1, 1]} : vector<2x8x96xf32> to vector<2x8x32xf32>
    %cst_18 = arith.constant 0.353553385 : f32
    %35 = vector.broadcast %cst_18 : f32 to vector<2x8x32xf32>
    %36 = arith.mulf %34, %35 : vector<2x8x32xf32>
    %37 = vector.extract_strided_slice %33 {offsets = [0, 0, 32], sizes = [2, 8, 32], strides = [1, 1, 1]} : vector<2x8x96xf32> to vector<2x8x32xf32>
    %38 = vector.extract_strided_slice %33 {offsets = [0, 0, 64], sizes = [2, 8, 32], strides = [1, 1, 1]} : vector<2x8x96xf32> to vector<2x8x32xf32>
    %39 = vector.shape_cast %5 : vector<2x8xf32> to vector<2x1x8xf32>
    %40 = vector.extract_strided_slice %36 {offsets = [0, 0, 0], sizes = [2, 8, 8], strides = [1, 1, 1]} : vector<2x8x32xf32> to vector<2x8x8xf32>
    %41 = vector.extract_strided_slice %37 {offsets = [0, 0, 0], sizes = [2, 8, 8], strides = [1, 1, 1]} : vector<2x8x32xf32> to vector<2x8x8xf32>
    %42 = vector.extract_strided_slice %38 {offsets = [0, 0, 0], sizes = [2, 8, 8], strides = [1, 1, 1]} : vector<2x8x32xf32> to vector<2x8x8xf32>
    "tpu.trace_start"() <{level = 10 : i32, message = "bqd,bkd->bqk"}> : () -> ()
    %cst_19 = arith.constant dense<0.000000e+00> : vector<2x8x8xf32>
    %43 = tpu.matmul %40, %41, %cst_19 {dimension_numbers = #tpu.dot_dimension_numbers<[2], [2], [1], [1], [0, 0, 0, 1, 1, 1], [0], [0]>} : vector<2x8x8xf32>, vector<2x8x8xf32>, vector<2x8x8xf32> -> vector<2x8x8xf32>
    "tpu.trace_stop"() : () -> ()
    %44 = vector.broadcast %39 : vector<2x1x8xf32> to vector<2x8x8xf32>
    %45 = arith.addf %43, %44 : vector<2x8x8xf32>
    %cst_20 = arith.constant dense<0xFF800000> : vector<2x8xf32>
    %46 = vector.multi_reduction <maximumf>, %45, %cst_20 [2] : vector<2x8x8xf32> to vector<2x8xf32>
    %47 = vector.shape_cast %46 : vector<2x8xf32> to vector<2x8x1xf32>
    %48 = vector.broadcast %47 : vector<2x8x1xf32> to vector<2x8x8xf32>
    %49 = arith.subf %45, %48 : vector<2x8x8xf32>
    %50 = math.exp %49 : vector<2x8x8xf32>
    %cst_21 = arith.constant dense<0.000000e+00> : vector<2x8xf32>
    %51 = vector.multi_reduction <add>, %50, %cst_21 [2] : vector<2x8x8xf32> to vector<2x8xf32>
    %52 = vector.shape_cast %51 : vector<2x8xf32> to vector<2x8x1xf32>
    %53 = tpu.reciprocal %52 {approx = true} : vector<2x8x1xf32> -> vector<2x8x1xf32>
    %54 = vector.broadcast %53 : vector<2x8x1xf32> to vector<2x8x8xf32>
    %55 = arith.mulf %50, %54 : vector<2x8x8xf32>
    "tpu.trace_start"() <{level = 10 : i32, message = "bqk,bkd->bqd"}> : () -> ()
    %cst_22 = arith.constant dense<0.000000e+00> : vector<2x8x8xf32>
    %56 = tpu.matmul %55, %42, %cst_22 {dimension_numbers = #tpu.dot_dimension_numbers<[2], [1], [1], [2], [0, 0, 0, 1, 1, 2], [0], [0]>} : vector<2x8x8xf32>, vector<2x8x8xf32>, vector<2x8x8xf32> -> vector<2x8x8xf32>
    "tpu.trace_stop"() : () -> ()
    %57 = vector.extract_strided_slice %36 {offsets = [0, 0, 8], sizes = [2, 8, 8], strides = [1, 1, 1]} : vector<2x8x32xf32> to vector<2x8x8xf32>
    %58 = vector.extract_strided_slice %37 {offsets = [0, 0, 8], sizes = [2, 8, 8], strides = [1, 1, 1]} : vector<2x8x32xf32> to vector<2x8x8xf32>
    %59 = vector.extract_strided_slice %38 {offsets = [0, 0, 8], sizes = [2, 8, 8], strides = [1, 1, 1]} : vector<2x8x32xf32> to vector<2x8x8xf32>
    "tpu.trace_start"() <{level = 10 : i32, message = "bqd,bkd->bqk"}> : () -> ()
    %cst_23 = arith.constant dense<0.000000e+00> : vector<2x8x8xf32>
    %60 = tpu.matmul %57, %58, %cst_23 {dimension_numbers = #tpu.dot_dimension_numbers<[2], [2], [1], [1], [0, 0, 0, 1, 1, 1], [0], [0]>} : vector<2x8x8xf32>, vector<2x8x8xf32>, vector<2x8x8xf32> -> vector<2x8x8xf32>
    "tpu.trace_stop"() : () -> ()
    %61 = vector.broadcast %39 : vector<2x1x8xf32> to vector<2x8x8xf32>
    %62 = arith.addf %60, %61 : vector<2x8x8xf32>
    %cst_24 = arith.constant dense<0xFF800000> : vector<2x8xf32>
    %63 = vector.multi_reduction <maximumf>, %62, %cst_24 [2] : vector<2x8x8xf32> to vector<2x8xf32>
    %64 = vector.shape_cast %63 : vector<2x8xf32> to vector<2x8x1xf32>
    %65 = vector.broadcast %64 : vector<2x8x1xf32> to vector<2x8x8xf32>
    %66 = arith.subf %62, %65 : vector<2x8x8xf32>
    %67 = math.exp %66 : vector<2x8x8xf32>
    %cst_25 = arith.constant dense<0.000000e+00> : vector<2x8xf32>
    %68 = vector.multi_reduction <add>, %67, %cst_25 [2] : vector<2x8x8xf32> to vector<2x8xf32>
    %69 = vector.shape_cast %68 : vector<2x8xf32> to vector<2x8x1xf32>
    %70 = tpu.reciprocal %69 {approx = true} : vector<2x8x1xf32> -> vector<2x8x1xf32>
    %71 = vector.broadcast %70 : vector<2x8x1xf32> to vector<2x8x8xf32>
    %72 = arith.mulf %67, %71 : vector<2x8x8xf32>
    "tpu.trace_start"() <{level = 10 : i32, message = "bqk,bkd->bqd"}> : () -> ()
    %cst_26 = arith.constant dense<0.000000e+00> : vector<2x8x8xf32>
    %73 = tpu.matmul %72, %59, %cst_26 {dimension_numbers = #tpu.dot_dimension_numbers<[2], [1], [1], [2], [0, 0, 0, 1, 1, 2], [0], [0]>} : vector<2x8x8xf32>, vector<2x8x8xf32>, vector<2x8x8xf32> -> vector<2x8x8xf32>
    "tpu.trace_stop"() : () -> ()
    %74 = vector.extract_strided_slice %36 {offsets = [0, 0, 16], sizes = [2, 8, 8], strides = [1, 1, 1]} : vector<2x8x32xf32> to vector<2x8x8xf32>
    %75 = vector.extract_strided_slice %37 {offsets = [0, 0, 16], sizes = [2, 8, 8], strides = [1, 1, 1]} : vector<2x8x32xf32> to vector<2x8x8xf32>
    %76 = vector.extract_strided_slice %38 {offsets = [0, 0, 16], sizes = [2, 8, 8], strides = [1, 1, 1]} : vector<2x8x32xf32> to vector<2x8x8xf32>
    "tpu.trace_start"() <{level = 10 : i32, message = "bqd,bkd->bqk"}> : () -> ()
    %cst_27 = arith.constant dense<0.000000e+00> : vector<2x8x8xf32>
    %77 = tpu.matmul %74, %75, %cst_27 {dimension_numbers = #tpu.dot_dimension_numbers<[2], [2], [1], [1], [0, 0, 0, 1, 1, 1], [0], [0]>} : vector<2x8x8xf32>, vector<2x8x8xf32>, vector<2x8x8xf32> -> vector<2x8x8xf32>
    "tpu.trace_stop"() : () -> ()
    %78 = vector.broadcast %39 : vector<2x1x8xf32> to vector<2x8x8xf32>
    %79 = arith.addf %77, %78 : vector<2x8x8xf32>
    %cst_28 = arith.constant dense<0xFF800000> : vector<2x8xf32>
    %80 = vector.multi_reduction <maximumf>, %79, %cst_28 [2] : vector<2x8x8xf32> to vector<2x8xf32>
    %81 = vector.shape_cast %80 : vector<2x8xf32> to vector<2x8x1xf32>
    %82 = vector.broadcast %81 : vector<2x8x1xf32> to vector<2x8x8xf32>
    %83 = arith.subf %79, %82 : vector<2x8x8xf32>
    %84 = math.exp %83 : vector<2x8x8xf32>
    %cst_29 = arith.constant dense<0.000000e+00> : vector<2x8xf32>
    %85 = vector.multi_reduction <add>, %84, %cst_29 [2] : vector<2x8x8xf32> to vector<2x8xf32>
    %86 = vector.shape_cast %85 : vector<2x8xf32> to vector<2x8x1xf32>
    %87 = tpu.reciprocal %86 {approx = true} : vector<2x8x1xf32> -> vector<2x8x1xf32>
    %88 = vector.broadcast %87 : vector<2x8x1xf32> to vector<2x8x8xf32>
    %89 = arith.mulf %84, %88 : vector<2x8x8xf32>
    "tpu.trace_start"() <{level = 10 : i32, message = "bqk,bkd->bqd"}> : () -> ()
    %cst_30 = arith.constant dense<0.000000e+00> : vector<2x8x8xf32>
    %90 = tpu.matmul %89, %76, %cst_30 {dimension_numbers = #tpu.dot_dimension_numbers<[2], [1], [1], [2], [0, 0, 0, 1, 1, 2], [0], [0]>} : vector<2x8x8xf32>, vector<2x8x8xf32>, vector<2x8x8xf32> -> vector<2x8x8xf32>
    "tpu.trace_stop"() : () -> ()
    %91 = vector.extract_strided_slice %36 {offsets = [0, 0, 24], sizes = [2, 8, 8], strides = [1, 1, 1]} : vector<2x8x32xf32> to vector<2x8x8xf32>
    %92 = vector.extract_strided_slice %37 {offsets = [0, 0, 24], sizes = [2, 8, 8], strides = [1, 1, 1]} : vector<2x8x32xf32> to vector<2x8x8xf32>
    %93 = vector.extract_strided_slice %38 {offsets = [0, 0, 24], sizes = [2, 8, 8], strides = [1, 1, 1]} : vector<2x8x32xf32> to vector<2x8x8xf32>
    "tpu.trace_start"() <{level = 10 : i32, message = "bqd,bkd->bqk"}> : () -> ()
    %cst_31 = arith.constant dense<0.000000e+00> : vector<2x8x8xf32>
    %94 = tpu.matmul %91, %92, %cst_31 {dimension_numbers = #tpu.dot_dimension_numbers<[2], [2], [1], [1], [0, 0, 0, 1, 1, 1], [0], [0]>} : vector<2x8x8xf32>, vector<2x8x8xf32>, vector<2x8x8xf32> -> vector<2x8x8xf32>
    "tpu.trace_stop"() : () -> ()
    %95 = vector.broadcast %39 : vector<2x1x8xf32> to vector<2x8x8xf32>
    %96 = arith.addf %94, %95 : vector<2x8x8xf32>
    %cst_32 = arith.constant dense<0xFF800000> : vector<2x8xf32>
    %97 = vector.multi_reduction <maximumf>, %96, %cst_32 [2] : vector<2x8x8xf32> to vector<2x8xf32>
    %98 = vector.shape_cast %97 : vector<2x8xf32> to vector<2x8x1xf32>
    %99 = vector.broadcast %98 : vector<2x8x1xf32> to vector<2x8x8xf32>
    %100 = arith.subf %96, %99 : vector<2x8x8xf32>
    %101 = math.exp %100 : vector<2x8x8xf32>
    %cst_33 = arith.constant dense<0.000000e+00> : vector<2x8xf32>
    %102 = vector.multi_reduction <add>, %101, %cst_33 [2] : vector<2x8x8xf32> to vector<2x8xf32>
    %103 = vector.shape_cast %102 : vector<2x8xf32> to vector<2x8x1xf32>
    %104 = tpu.reciprocal %103 {approx = true} : vector<2x8x1xf32> -> vector<2x8x1xf32>
    %105 = vector.broadcast %104 : vector<2x8x1xf32> to vector<2x8x8xf32>
    %106 = arith.mulf %101, %105 : vector<2x8x8xf32>
    "tpu.trace_start"() <{level = 10 : i32, message = "bqk,bkd->bqd"}> : () -> ()
    %cst_34 = arith.constant dense<0.000000e+00> : vector<2x8x8xf32>
    %107 = tpu.matmul %106, %93, %cst_34 {dimension_numbers = #tpu.dot_dimension_numbers<[2], [1], [1], [2], [0, 0, 0, 1, 1, 2], [0], [0]>} : vector<2x8x8xf32>, vector<2x8x8xf32>, vector<2x8x8xf32> -> vector<2x8x8xf32>
    "tpu.trace_stop"() : () -> ()
    %108 = tpu.concatenate %56, %73, %90, %107 in 2 : vector<2x8x8xf32>, vector<2x8x8xf32>, vector<2x8x8xf32>, vector<2x8x8xf32> -> vector<2x8x32xf32>
    %109 = vector.shape_cast %108 : vector<2x8x32xf32> to vector<16x32xf32>
    %c0_35 = arith.constant 0 : index
    %c0_36 = arith.constant 0 : index
    %110 = vector.load %arg6[%c0_35, %c0_36] : memref<32x32xf32, #tpu.memory_space<vmem>>, vector<32x32xf32>
    %cst_37 = arith.constant dense<0.000000e+00> : vector<16x32xf32>
    %111 = tpu.matmul %109, %110, %cst_37 {dimension_numbers = #tpu.dot_dimension_numbers<[1], [0], [0], [1], [0, 0, 1, 1], [], []>} : vector<16x32xf32>, vector<32x32xf32>, vector<16x32xf32> -> vector<16x32xf32>
    %c0_38 = arith.constant 0 : index
    %c0_39 = arith.constant 0 : index
    %112 = vector.load %arg7[%c0_38, %c0_39] : memref<1x32xf32, #tpu.memory_space<vmem>>, vector<1x32xf32>
    %113 = vector.broadcast %112 : vector<1x32xf32> to vector<16x32xf32>
    %114 = arith.addf %111, %113 : vector<16x32xf32>
    %115 = arith.addf %0, %114 : vector<16x32xf32>
    %c0_40 = arith.constant 0 : index
    %c0_41 = arith.constant 0 : index
    %116 = vector.load %arg8[%c0_40, %c0_41] : memref<1x32xf32, #tpu.memory_space<vmem>>, vector<1x32xf32>
    %c0_42 = arith.constant 0 : index
    %c0_43 = arith.constant 0 : index
    %117 = vector.load %arg9[%c0_42, %c0_43] : memref<1x32xf32, #tpu.memory_space<vmem>>, vector<1x32xf32>
    %cst_44 = arith.constant dense<0.000000e+00> : vector<16xf32>
    %118 = vector.multi_reduction <add>, %115, %cst_44 [1] : vector<16x32xf32> to vector<16xf32>
    %119 = vector.shape_cast %118 : vector<16xf32> to vector<16x1xf32>
    %cst_45 = arith.constant 3.200000e+01 : f32
    %120 = vector.broadcast %cst_45 : f32 to vector<16x1xf32>
    %121 = arith.divf %119, %120 : vector<16x1xf32>
    %122 = vector.broadcast %121 : vector<16x1xf32> to vector<16x32xf32>
    %123 = arith.subf %115, %122 : vector<16x32xf32>
    %124 = arith.mulf %123, %123 : vector<16x32xf32>
    %cst_46 = arith.constant dense<0.000000e+00> : vector<16xf32>
    %125 = vector.multi_reduction <add>, %124, %cst_46 [1] : vector<16x32xf32> to vector<16xf32>
    %126 = vector.shape_cast %125 : vector<16xf32> to vector<16x1xf32>
    %cst_47 = arith.constant 3.200000e+01 : f32
    %127 = vector.broadcast %cst_47 : f32 to vector<16x1xf32>
    %128 = arith.divf %126, %127 : vector<16x1xf32>
    %cst_48 = arith.constant 9.99999996E-13 : f32
    %129 = vector.broadcast %cst_48 : f32 to vector<16x1xf32>
    %130 = arith.addf %128, %129 : vector<16x1xf32>
    %131 = math.rsqrt %130 : vector<16x1xf32>
    %132 = vector.broadcast %131 : vector<16x1xf32> to vector<16x32xf32>
    %133 = arith.mulf %123, %132 : vector<16x32xf32>
    %134 = vector.broadcast %116 : vector<1x32xf32> to vector<16x32xf32>
    %135 = arith.mulf %133, %134 : vector<16x32xf32>
    %136 = vector.broadcast %117 : vector<1x32xf32> to vector<16x32xf32>
    %137 = arith.addf %135, %136 : vector<16x32xf32>
    %c0_49 = arith.constant 0 : index
    %c0_50 = arith.constant 0 : index
    %138 = vector.load %arg10[%c0_49, %c0_50] : memref<32x64xf32, #tpu.memory_space<vmem>>, vector<32x64xf32>
    %cst_51 = arith.constant dense<0.000000e+00> : vector<16x64xf32>
    %139 = tpu.matmul %137, %138, %cst_51 {dimension_numbers = #tpu.dot_dimension_numbers<[1], [0], [0], [1], [0, 0, 1, 1], [], []>} : vector<16x32xf32>, vector<32x64xf32>, vector<16x64xf32> -> vector<16x64xf32>
    %c0_52 = arith.constant 0 : index
    %c0_53 = arith.constant 0 : index
    %140 = vector.load %arg11[%c0_52, %c0_53] : memref<1x64xf32, #tpu.memory_space<vmem>>, vector<1x64xf32>
    %141 = vector.broadcast %140 : vector<1x64xf32> to vector<16x64xf32>
    %142 = arith.addf %139, %141 : vector<16x64xf32>
    %cst_54 = arith.constant 5.000000e-01 : f32
    %143 = vector.broadcast %cst_54 : f32 to vector<16x64xf32>
    %144 = arith.mulf %143, %142 : vector<16x64xf32>
    %cst_55 = arith.constant 4.471500e-02 : f32
    %145 = vector.broadcast %cst_55 : f32 to vector<16x64xf32>
    %146 = arith.mulf %145, %142 : vector<16x64xf32>
    %147 = arith.mulf %146, %142 : vector<16x64xf32>
    %148 = arith.mulf %147, %142 : vector<16x64xf32>
    %149 = arith.addf %142, %148 : vector<16x64xf32>
    %cst_56 = arith.constant 0.797884583 : f32
    %150 = vector.broadcast %cst_56 : f32 to vector<16x64xf32>
    %151 = arith.mulf %150, %149 : vector<16x64xf32>
    %152 = math.tanh %151 : vector<16x64xf32>
    %cst_57 = arith.constant 1.000000e+00 : f32
    %153 = vector.broadcast %cst_57 : f32 to vector<16x64xf32>
    %154 = arith.addf %153, %152 : vector<16x64xf32>
    %155 = arith.mulf %144, %154 : vector<16x64xf32>
    %c0_58 = arith.constant 0 : index
    %c0_59 = arith.constant 0 : index
    %156 = vector.load %arg12[%c0_58, %c0_59] : memref<64x32xf32, #tpu.memory_space<vmem>>, vector<64x32xf32>
    %cst_60 = arith.constant dense<0.000000e+00> : vector<16x32xf32>
    %157 = tpu.matmul %155, %156, %cst_60 {dimension_numbers = #tpu.dot_dimension_numbers<[1], [0], [0], [1], [0, 0, 1, 1], [], []>} : vector<16x64xf32>, vector<64x32xf32>, vector<16x32xf32> -> vector<16x32xf32>
    %c0_61 = arith.constant 0 : index
    %c0_62 = arith.constant 0 : index
    %158 = vector.load %arg13[%c0_61, %c0_62] : memref<1x32xf32, #tpu.memory_space<vmem>>, vector<1x32xf32>
    %159 = vector.broadcast %158 : vector<1x32xf32> to vector<16x32xf32>
    %160 = arith.addf %157, %159 : vector<16x32xf32>
    %161 = arith.addf %115, %160 : vector<16x32xf32>
    %c0_63 = arith.constant 0 : index
    %c0_64 = arith.constant 0 : index
    %162 = vector.load %arg14[%c0_63, %c0_64] : memref<16x32xf32, #tpu.memory_space<vmem>>, vector<16x32xf32>
    tpu.vector_store %arg14[%c0_63, %c0_64], %161 {strides = array<i32>} : memref<16x32xf32, #tpu.memory_space<vmem>>, vector<16x32xf32>,
    return
  }
}

</mosaic_0001>

<bundles_post_ra>
// kernel: transformer_encoder_layer.1
= control target key start
LH: loop header
LB: loop body
LE: loop exit
PB: predicated region body
PF: predicated region fallthrough
CT: control target
= control target key end

     0   :  { %vm55_vm0 = vcmask 261120   ;;  %s2689_s0 = inlined_call_operand.vmem [shape: f32[16,32], index: 0, kind: input, shape index: {}]   ;;  %s2690_s1 = inlined_call_operand.vmem [shape: f32[2,8], index: 1, kind: input, shape index: {}]   ;;  %s2691_s2 = inlined_call_operand.vmem [shape: f32[1,32], index: 2, kind: input, shape index: {}]   ;;  %s2692_s3 = inlined_call_operand.vmem [shape: f32[1,32], index: 3, kind: input, shape index: {}]   ;;  %s2693_s4 = inlined_call_operand.vmem [shape: f32[32,96], index: 4, kind: input, shape index: {}]   ;;  %s2694_s5 = inlined_call_operand.vmem [shape: f32[1,96], index: 5, kind: input, shape index: {}]   ;;  %s2695_s6 = inlined_call_operand.vmem [shape: f32[32,32], index: 6, kind: input, shape index: {}]   ;;  %s2696_s7 = inlined_call_operand.vmem [shape: f32[1,32], index: 7, kind: input, shape index: {}]   ;;  %s2697_s8 = inlined_call_operand.vmem [shape: f32[1,32], index: 8, kind: input, shape index: {}]   ;;  %s2698_s9 = inlined_call_operand.vmem [shape: f32[1,32], index: 9, kind: input, shape index: {}]   ;;  %s2699_s10 = inlined_call_operand.vmem [shape: f32[32,64], index: 10, kind: input, shape index: {}]   ;;  %s2700_s11 = inlined_call_operand.vmem [shape: f32[1,64], index: 11, kind: input, shape index: {}]   ;;  %s2701_s12 = inlined_call_operand.vmem [shape: f32[64,32], index: 12, kind: input, shape index: {}]   ;;  %s2702_s13 = inlined_call_operand.vmem [shape: f32[1,32], index: 13, kind: input, shape index: {}]   ;;  %s2703_s14 = inlined_call_operand.hbm [shape: f32[16,32], index: 14, kind: output, shape index: {}]  }
   0x1   :  { %v2400_v0 = vld [vmem:[%s2689_s0] sm:$0xff]  ;;  %v2405_v1 = vld [vmem:[%s2689_s0 + $0x8] sm:$0xff] }
   0x2   :  { %19 = vsyncpa [#allocation3], 0  ;;  %v56_v2 = vsel %vm55_vm0, %v2400_v0, 0.0  ;;  %v59_v3 = vsel %vm55_vm0, %v2405_v1, 0.0  ;;  %v99_v14 = vld [vmem:[%s2693_s4] sm:$0xff]  ;;  %v100_v15 = vld [vmem:[%s2693_s4 + $0x8] sm:$0xff]  ;;  %v197_v48 = vlaneseq }
   0x3   :  { %57 = vadd.xlane.f32.xlu0 %v56_v2  ;;  %v101_v16 = vld [vmem:[%s2693_s4 + $0x10] sm:$0xff]  ;;  %v2176_v17 = vpack.c.bf16 %v100_v15, %v99_v14  ;;  %v102_v18 = vld [vmem:[%s2693_s4 + $0x18] sm:$0xff]  ;;  %v1944_v27 = vld [vmem:[%s2691_s2] ss:$0 sm:$0xff]  ;;  %v2303_v36 = vmov 0.0   ;;  %vm2304_vm1 = vmmov 0  }
   0x4   :  { %v2180_v19 = vpack.c.bf16 %v102_v18, %v101_v16  ;;  %v1945_v29 = vld [vmem:[%s2692_s3] ss:$0 sm:$0xff]  ;;  %2065 = vmatprep.subr.mxu0 %v2303_v36  ;;  %2067 = vmatprep.mubr.msk.f32.mxu0 %vm2304_vm1, %v2303_v36  ;;  %s2305_s27 = smov 96   ;;  %vm229_vm2 = vcmask 64512   ;;  %v2306_v46 = vmov 1966171168  }
   0x5   :  { %2177 = vmatprep.subr.bf16.mxu1 %v2176_v17  ;;  %v1946_v37 = vld [vmem:[%s2694_s5] ss:$0 sm:$0xff]  ;;  %v195_v47 = vunpack.c.l.s4 %v2306_v46  ;;  %v198_v52 = vshrl.u32 %v197_v48, 7  ;;  %s2308_s29 = smov 88   ;;  %s2309_s30 = smov 120   ;;  %vm1576_vm3 = vcmask 195584  }
   0x6   :  { %2179 = vmatpush3.bf16.msra.mxu1 %v2176_v17  ;;  %v50_v49 = vld [vmem:[%s2690_s1] sm:$0x3]  ;;  %s2307_s1 = smov 64   ;;  %s2310_s15 = smov 56   ;;  %vm1573_vm4 = vcmask 130048   ;;  %vm1842_vm5 = vcmask 523264  }
   0x7   :  { %60 = vadd.xlane.f32.xlu0 %v59_v3  ;;  %2181 = vmatprep.subr.bf16.mxu1 %v2180_v19  ;;  %v51_v50 = vsub.f32 1.0, %v50_v49  ;;  %v196_v51 = vunpack.c.0.s8 %v195_v47  ;;  %v218_v57 = vsub.s32 0, %v198_v52  ;;  %s2311_s16 = smov 80   ;;  %s2312_s0 = smov 112  }
   0x8   :  { %s2313_s17 = smov 48   ;;  %s2314_s18 = smov 72  }
   0x9   :  { %v52_v53 = vmul.f32 -10000.0, %v51_v50  ;;  %v199_v54 = vsub.s32 %v196_v51, %v198_v52  ;;  %s2315_s19 = smov 104   ;;  %s2316_s20 = smov 40  }
   0xa   :  { %2183 = vmatpush3.bf16.msra.mxu1 %v2180_v19  ;;  %s2317_s21 = smov 8   ;;  %s2318_s22 = smov 16  }
   0xb   :  { %2055 = vmatprep.subr.mxu1 %v2303_v36  ;;  %v200_v55 = vrot.slane %v52_v53, %v199_v54  ;;  %s2319_s5 = smov 24  }
   0xd   :  { %v208_v56 = vrot.slane %v200_v55, %v199_v54  ;;  %v201_v58 = vcombine.high %v200_v55, %v200_v55 }
   0xf   :  { %v2471_v59 = vrot.slane %v208_v56, %v218_v57  ;;  %v215_v60 = vrot.slane %v201_v58, %v199_v54 }
  0x11   :  { %v2474_v2 = vrot.slane %v215_v60, %v218_v57 }
  0x90   :  { %v58_v4 = vpop.xlane.xlu0 %57 }
  0x91   :  { %v63_v5 = vmul.f32 0.03125, %v58_v4 }
  0x93   :  { %v65_v6 = vsub.f32 %v2400_v0, %v63_v5 }
  0x94   :  { %v61_v7 = vpop.xlane.xlu0 %60 }
  0x95   :  { %v64_v8 = vmul.f32 0.03125, %v61_v7  ;;  %v67_v9 = vmul.f32 %v65_v6, %v65_v6 }
  0x97   :  { %v66_v10 = vsub.f32 %v2405_v1, %v64_v8  ;;  %v69_v11 = vsel %vm55_vm0, %v67_v9, 0.0 }
  0x98   :  { %70 = vadd.xlane.f32.xlu1 %v69_v11 }
  0x99   :  { %v68_v12 = vmul.f32 %v66_v10, %v66_v10 }
  0x9b   :  { %v72_v13 = vsel %vm55_vm0, %v68_v12, 0.0 }
  0x9c   :  { %73 = vadd.xlane.f32.xlu1 %v72_v13 }
 0x125   :  { %v71_v20 = vpop.xlane.xlu1 %70 }
 0x126   :  { %v75_v21 = vmul.f32 0.03125, %v71_v20 }
 0x128   :  { %v77_v22 = vadd.f32 1e-12, %v75_v21 }
 0x129   :  { %v74_v23 = vpop.xlane.xlu1 %73 }
 0x12a   :  { %2235 = vrsqrt.f32 %v77_v22  ;;  %v76_v24 = vmul.f32 0.03125, %v74_v23 }
 0x12c   :  { %v78_v25 = vadd.f32 1e-12, %v76_v24 }
 0x12e   :  { %2237 = vrsqrt.f32 %v78_v25 }
 0x134   :  { %v2236_v26 = vpop.eup %2235 }
 0x135   :  { %v81_v28 = vmul.f32 %v2236_v26, %v65_v6 }
 0x137   :  { %v89_v30 = vmul.f32 %v1944_v27, %v81_v28 }
 0x138   :  { %v2238_v31 = vpop.eup %2237 }
 0x139   :  { %v82_v32 = vmul.f32 %v2238_v31, %v66_v10  ;;  %v97_v33 = vadd.f32 %v1945_v29, %v89_v30 }
 0x13b   :  { %v90_v34 = vmul.f32 %v1944_v27, %v82_v32  ;;  %2052 = vmatprep.mubr.msk.f32.mxu1 %vm55_vm0, %v97_v33 }
 0x13d   :  { %v98_v35 = vadd.f32 %v1945_v29, %v90_v34 }
 0x13f   :  { %2053 = vmatmul.mubr.msk.f32.vlgmr.msra.gmra.mrb[0].mxu1 %vm55_vm0, %v98_v35 }
 0x140   :  { %2057 = vmatprep.mubr.msk.f32.mxu1 %vm2304_vm1, %v2303_v36 }
 0x212   :  { %v2054_v38 = vpop.f32.mrb[0].mxu1 }
 0x213   :  { %v2444_v39 = vadd.f32 %v2054_v38, %v1946_v37  ;;  %v182_v40 = vpop.f32.mrb[1].mxu1 }
 0x214   :  { %v2446_v41 = vadd.f32 %v1946_v37, %v182_v40 }
 0x215   :  { %306 = vrot.lane.b32.xlu1 %v2444_v39, %s2305_s27  ;;  %v2461_v45 = vmul.f32 0.35355338, %v2444_v39 }
 0x216   :  { %227 = vrot.lane.b32.xlu0 %v2446_v41, %s2305_s27  ;;  %v2452_v43 = vmul.f32 0.35355338, %v2446_v41 }
 0x287   :  { %v307_v44 = vpop.permute.xlu1 %306 }
 0x288   :  { %v228_v42 = vpop.permute.xlu0 %227 }
 0x289   :  { %2056 = vmatpush3.xpose.msk.msra.mxu1 %vm229_vm2, %v228_v42 }
 0x28a   :  { %2060 = vmatprep.subr.mxu1 %v2303_v36 }
 0x28c   :  { %2058 = vmatmul.mubr.msk.f32.vlgmr.msra.gmra.mrb[2].mxu1 %vm229_vm2, %v2452_v43 }
 0x28d   :  { %2061 = vmatpush3.xpose.msk.msra.mxu1 %vm229_vm2, %v307_v44  ;;  %2062 = vmatprep.mubr.msk.f32.mxu1 %vm2304_vm1, %v2303_v36 }
 0x28e   :  { %2070 = vmatprep.subr.mxu1 %v2303_v36 }
 0x290   :  { %2063 = vmatmul.mubr.msk.f32.vlgmr.msra.gmra.mrb[4].mxu1 %vm229_vm2, %v2461_v45 }
 0x291   :  { %2072 = vmatprep.mubr.msk.f32.mxu1 %vm2304_vm1, %v2303_v36 }
 0x35f   :  { %v301_v61 = vpop.f32.mrb[2].mxu1 }
 0x360   :  { %v302_v62 = vadd.f32 %v301_v61, %v2471_v59  ;;  %v2059_v63 = vpop.f32.mrb[3].mxu1 }
 0x362   :  { %v383_v3 = vsel %vm229_vm2, %v302_v62, -inf }
 0x363   :  { %384 = vmax.xlane.f32.xlu1 %v383_v3  ;;  %v379_v4 = vpop.f32.mrb[4].mxu1 }
 0x364   :  { %v380_v5 = vadd.f32 %v379_v4, %v2474_v2  ;;  %v2064_v6 = vpop.f32.mrb[5].mxu1 }
 0x366   :  { %v386_v7 = vsel %vm229_vm2, %v380_v5, -inf }
 0x367   :  { %387 = vmax.xlane.f32.xlu0 %v386_v7 }
 0x374   :  { %481 = vrot.lane.b32.xlu1 %v2444_v39, %s2307_s1 }
 0x378   :  { %559 = vrot.lane.b32.xlu1 %v2446_v41, %s2308_s29 }
 0x37c   :  { %637 = vrot.lane.b32.xlu1 %v2444_v39, %s2308_s29 }
 0x37d   :  { %405 = vrot.lane.b32.xlu0 %v2446_v41, %s2307_s1 }
 0x3f0   :  { %v385_v8 = vpop.xlane.xlu1 %384 }
 0x3f1   :  { %v389_v9 = vsub.f32 %v302_v62, %v385_v8 }
 0x3f3   :  { %v391_v10 = vmul.f32 1.442695, %v389_v9 }
 0x3f4   :  { %v482_v11 = vpop.permute.xlu1 %481  ;;  %v388_v12 = vpop.xlane.xlu0 %387 }
 0x3f5   :  { %2239 = vpow2.f32 %v391_v10  ;;  %v390_v13 = vsub.f32 %v380_v5, %v388_v12  ;;  %2071 = vmatpush3.msra.mxu1 %v482_v11 }
 0x3f6   :  { %2080 = vmatprep.subr.mxu1 %v2303_v36 }
 0x3f7   :  { %v393_v14 = vmul.f32 1.442695, %v390_v13 }
 0x3f8   :  { %v406_v15 = vpop.permute.xlu0 %405  ;;  %v560_v20 = vpop.permute.xlu1 %559 }
 0x3f9   :  { %2241 = vpow2.f32 %v393_v14  ;;  %2066 = vmatpush3.msra.mxu0 %v406_v15 }
 0x3fa   :  { %2075 = vmatprep.subr.mxu0 %v2303_v36 }
 0x3fc   :  { %v638_v21 = vpop.permute.xlu1 %637 }
 0x3ff   :  { %v2240_v16 = vpop.eup %2239 }
 0x400   :  { %v395_v17 = vsel %vm229_vm2, %v2240_v16, 0.0 }
 0x401   :  { %396 = vadd.xlane.f32.xlu0 %v395_v17 }
 0x403   :  { %v2242_v18 = vpop.eup %2241 }
 0x404   :  { %v398_v19 = vsel %vm229_vm2, %v2242_v18, 0.0 }
 0x405   :  { %399 = vadd.xlane.f32.xlu1 %v398_v19 }
 0x416   :  { %635 = vrot.lane.b32.xlu1 %v2461_v45, %s2309_s30 }
 0x417   :  { %557 = vrot.lane.b32.xlu0 %v2452_v43, %s2309_s30 }
 0x48e   :  { %v397_v22 = vpop.xlane.xlu0 %396 }
 0x48f   :  { %2243 = vrcp.f32 %v397_v22 }
 0x492   :  { %v400_v23 = vpop.xlane.xlu1 %399  ;;  %v558_v28 = vpop.permute.xlu0 %557 }
 0x493   :  { %2245 = vrcp.f32 %v400_v23 }
 0x496   :  { %v636_v29 = vpop.permute.xlu1 %635 }
 0x499   :  { %v2244_v24 = vpop.eup %2243 }
 0x49a   :  { %v403_v25 = vmul.f32 %v2244_v24, %v2240_v16 }
 0x49c   :  { %2068 = vmatmul.mubr.msk.f32.vlgmr.msra.gmra.mrb[0].mxu0 %vm229_vm2, %v403_v25 }
 0x49d   :  { %v2246_v26 = vpop.eup %2245  ;;  %2076 = vmatpush3.xpose.msk.msra.mxu0 %vm229_vm2, %v560_v20  ;;  %2077 = vmatprep.mubr.msk.f32.mxu0 %vm2304_vm1, %v2303_v36 }
 0x49e   :  { %v404_v27 = vmul.f32 %v2246_v26, %v2242_v18  ;;  %2085 = vmatprep.subr.mxu0 %v2303_v36 }
 0x4a0   :  { %2073 = vmatmul.mubr.msk.f32.vlgmr.msra.gmra.mrb[6].mxu1 %vm229_vm2, %v404_v27  ;;  %2078 = vmatmul.mubr.msk.f32.vlgmr.msra.gmra.mrb[2].mxu0 %vm229_vm2, %v558_v28 }
 0x4a1   :  { %2081 = vmatpush3.xpose.msk.msra.mxu1 %vm229_vm2, %v638_v21  ;;  %2082 = vmatprep.mubr.msk.f32.mxu1 %vm2304_vm1, %v2303_v36 }
 0x4a2   :  { %2090 = vmatprep.subr.mxu1 %v2303_v36  ;;  %2087 = vmatprep.mubr.msk.f32.mxu0 %vm2304_vm1, %v2303_v36 }
 0x4a4   :  { %2083 = vmatmul.mubr.msk.f32.vlgmr.msra.gmra.mrb[8].mxu1 %vm229_vm2, %v636_v29 }
 0x4a5   :  { %2092 = vmatprep.mubr.msk.f32.mxu1 %vm2304_vm1, %v2303_v36 }
 0x56f   :  { %v2505_v30 = vpop.f32.mrb[0].mxu0 }
 0x570   :  { %v2069_v31 = vpop.f32.mrb[1].mxu0 }
 0x573   :  { %v2507_v32 = vpop.f32.mrb[6].mxu1  ;;  %v631_v33 = vpop.f32.mrb[2].mxu0 }
 0x574   :  { %v632_v34 = vadd.f32 %v631_v33, %v2471_v59  ;;  %v2074_v35 = vpop.f32.mrb[7].mxu1  ;;  %v2079_v37 = vpop.f32.mrb[3].mxu0 }
 0x576   :  { %v713_v38 = vsel %vm229_vm2, %v632_v34, -inf }
 0x577   :  { %714 = vmax.xlane.f32.xlu0 %v713_v38  ;;  %v709_v40 = vpop.f32.mrb[8].mxu1 }
 0x578   :  { %v710_v42 = vadd.f32 %v709_v40, %v2474_v2  ;;  %v2084_v44 = vpop.f32.mrb[9].mxu1 }
 0x57a   :  { %v716_v46 = vsel %vm229_vm2, %v710_v42, -inf }
 0x57b   :  { %717 = vmax.xlane.f32.xlu1 %v716_v46 }
 0x58c   :  { %811 = vrot.lane.b32.xlu1 %v2444_v39, %s2310_s15 }
 0x58d   :  { %735 = vrot.lane.b32.xlu0 %v2446_v41, %s2310_s15  ;;  %s2320_s15 = smov [#allocation2]  }
 0x590   :  { %889 = vrot.lane.b32.xlu1 %v2446_v41, %s2311_s16 }
 0x594   :  { %967 = vrot.lane.b32.xlu1 %v2444_v39, %s2311_s16  ;;  %s1933_s16 = sshll.u32 %s2320_s15, 4  ;;  %s1934_s16 = int_to_ptr.vmem [resolvable:$true] %s1933_s16 }
 0x595   :  { %p2284_p1 = scmp.lt.s32.totalorder %s1934_s16, %s1934_s16 }
 0x598   :  { %965 = vrot.lane.b32.xlu1 %v2461_v45, %s2312_s0 }
 0x604   :  { %v715_v47 = vpop.xlane.xlu0 %714 }
 0x605   :  { %v719_v48 = vsub.f32 %v632_v34, %v715_v47 }
 0x607   :  { %v721_v49 = vmul.f32 1.442695, %v719_v48 }
 0x608   :  { %v736_v50 = vpop.permute.xlu0 %735  ;;  %v718_v51 = vpop.xlane.xlu1 %717 }
 0x609   :  { %2247 = vpow2.f32 %v721_v49  ;;  %v720_v52 = vsub.f32 %v710_v42, %v718_v51  ;;  %2086 = vmatpush3.msra.mxu0 %v736_v50 }
 0x60a   :  { %2095 = vmatprep.subr.mxu0 %v2303_v36 }
 0x60b   :  { %v723_v53 = vmul.f32 1.442695, %v720_v52 }
 0x60c   :  { %v812_v54 = vpop.permute.xlu1 %811 }
 0x60d   :  { %2249 = vpow2.f32 %v723_v53  ;;  %2091 = vmatpush3.msra.mxu1 %v812_v54 }
 0x60e   :  { %2100 = vmatprep.subr.mxu1 %v2303_v36 }
 0x610   :  { %v890_v62 = vpop.permute.xlu1 %889 }
 0x613   :  { %v2248_v55 = vpop.eup %2247 }
 0x614   :  { %v725_v56 = vsel %vm229_vm2, %v2248_v55, 0.0  ;;  %v968_v5 = vpop.permute.xlu1 %967 }
 0x615   :  { %726 = vadd.xlane.f32.xlu0 %v725_v56 }
 0x617   :  { %v2250_v57 = vpop.eup %2249 }
 0x618   :  { %v728_v58 = vsel %vm229_vm2, %v2250_v57, 0.0  ;;  %v966_v8 = vpop.permute.xlu1 %965 }
 0x619   :  { %729 = vadd.xlane.f32.xlu0 %v728_v58 }
 0x62f   :  { %887 = vrot.lane.b32.xlu0 %v2452_v43, %s2312_s0  ;;  %s2279_s0 = scalar_lea.vmem %s1934_s16, 256 }
 0x630   :  { %p2280_p0 = scmp.ne.s32.totalorder %s1934_s16, %s2279_s0  ;;  %p2285_p2 = scmp.lt.s32.totalorder %s2279_s0, %s2279_s0 }
 0x632   :  { %p2286_p3 = por %p2285_p2, %p2284_p1 }
 0x634   :  { %p2287_p4 = pnand %p2286_p3, %p2280_p0 }
 0x6a2   :  { %v727_v60 = vpop.xlane.xlu0 %726 }
 0x6a3   :  { %2251 = vrcp.f32 %v727_v60 }
 0x6a6   :  { %v730_v61 = vpop.xlane.xlu0 %729 }
 0x6a7   :  { %2253 = vrcp.f32 %v730_v61 }
 0x6aa   :  { %v888_v7 = vpop.permute.xlu0 %887 }
 0x6ad   :  { %v2252_v63 = vpop.eup %2251 }
 0x6ae   :  { %v733_v3 = vmul.f32 %v2252_v63, %v2248_v55 }
 0x6b0   :  { %2088 = vmatmul.mubr.msk.f32.vlgmr.msra.gmra.mrb[4].mxu0 %vm229_vm2, %v733_v3 }
 0x6b1   :  { %v2254_v4 = vpop.eup %2253  ;;  %2096 = vmatpush3.xpose.msk.msra.mxu0 %vm229_vm2, %v890_v62  ;;  %2097 = vmatprep.mubr.msk.f32.mxu0 %vm2304_vm1, %v2303_v36 }
 0x6b2   :  { %v734_v6 = vmul.f32 %v2254_v4, %v2250_v57  ;;  %2105 = vmatprep.subr.mxu0 %v2303_v36 }
 0x6b4   :  { %2093 = vmatmul.mubr.msk.f32.vlgmr.msra.gmra.mrb[10].mxu1 %vm229_vm2, %v734_v6  ;;  %2098 = vmatmul.mubr.msk.f32.vlgmr.msra.gmra.mrb[6].mxu0 %vm229_vm2, %v888_v7 }
 0x6b5   :  { %2101 = vmatpush3.xpose.msk.msra.mxu1 %vm229_vm2, %v968_v5  ;;  %2102 = vmatprep.mubr.msk.f32.mxu1 %vm2304_vm1, %v2303_v36 }
 0x6b6   :  { %2110 = vmatprep.subr.mxu1 %v2303_v36  ;;  %2107 = vmatprep.mubr.msk.f32.mxu0 %vm2304_vm1, %v2303_v36 }
 0x6b8   :  { %2103 = vmatmul.mubr.msk.f32.vlgmr.msra.gmra.mrb[12].mxu1 %vm229_vm2, %v966_v8 }
 0x6b9   :  { %2112 = vmatprep.mubr.msk.f32.mxu1 %vm2304_vm1, %v2303_v36 }
 0x783   :  { %v2539_v9 = vpop.f32.mrb[4].mxu0 }
 0x784   :  { %v2089_v10 = vpop.f32.mrb[5].mxu0 }
 0x787   :  { %v2541_v11 = vpop.f32.mrb[10].mxu1  ;;  %v961_v12 = vpop.f32.mrb[6].mxu0 }
 0x788   :  { %v962_v13 = vadd.f32 %v961_v12, %v2471_v59  ;;  %v2094_v14 = vpop.f32.mrb[11].mxu1  ;;  %v2099_v15 = vpop.f32.mrb[7].mxu0 }
 0x789   :  { %v1579_v14 = vld [vmem:[%s2695_s6] sm:$0xff] }
 0x78a   :  { %v1043_v16 = vsel %vm229_vm2, %v962_v13, -inf }
 0x78b   :  { %1044 = vmax.xlane.f32.xlu0 %v1043_v16  ;;  %v1039_v17 = vpop.f32.mrb[12].mxu1  ;;  %v1581_v16 = vld [vmem:[%s2695_s6 + $0x10] sm:$0xff] }
 0x78c   :  { %v1040_v18 = vadd.f32 %v1039_v17, %v2474_v2  ;;  %v2104_v19 = vpop.f32.mrb[13].mxu1  ;;  %v1582_v17 = vld [vmem:[%s2695_s6 + $0x18] sm:$0xff] }
 0x78e   :  { %v1046_v20 = vsel %vm229_vm2, %v1040_v18, -inf }
 0x78f   :  { %1047 = vmax.xlane.f32.xlu1 %v1046_v20 }
 0x7a0   :  { %1141 = vrot.lane.b32.xlu1 %v2444_v39, %s2313_s17 }
 0x7a1   :  { %1065 = vrot.lane.b32.xlu0 %v2446_v41, %s2313_s17 }
 0x7a4   :  { %1219 = vrot.lane.b32.xlu1 %v2446_v41, %s2314_s18 }
 0x7a8   :  { %1297 = vrot.lane.b32.xlu1 %v2444_v39, %s2314_s18 }
 0x7ac   :  { %1295 = vrot.lane.b32.xlu1 %v2461_v45, %s2315_s19 }
 0x818   :  { %v1045_v21 = vpop.xlane.xlu0 %1044 }
 0x819   :  { %v1049_v22 = vsub.f32 %v962_v13, %v1045_v21 }
 0x81b   :  { %v1051_v23 = vmul.f32 1.442695, %v1049_v22 }
 0x81c   :  { %v1066_v24 = vpop.permute.xlu0 %1065  ;;  %v1048_v25 = vpop.xlane.xlu1 %1047 }
 0x81d   :  { %2255 = vpow2.f32 %v1051_v23  ;;  %v1050_v26 = vsub.f32 %v1040_v18, %v1048_v25  ;;  %2106 = vmatpush3.msra.mxu0 %v1066_v24  ;;  %v2188_v18 = vpack.c.bf16 %v1582_v17, %v1581_v16  ;;  %v1830_v16 = vld [vmem:[%s2701_s12 + $0x18] sm:$0xff] }
 0x81e   :  { %2115 = vmatprep.subr.mxu0 %v2303_v36 }
 0x81f   :  { %v1053_v27 = vmul.f32 1.442695, %v1050_v26 }
 0x820   :  { %v1142_v28 = vpop.permute.xlu1 %1141 }
 0x821   :  { %2257 = vpow2.f32 %v1053_v27  ;;  %2111 = vmatpush3.msra.mxu1 %v1142_v28 }
 0x822   :  { %2120 = vmatprep.subr.mxu1 %v2303_v36 }
 0x824   :  { %v1220_v37 = vpop.permute.xlu1 %1219 }
 0x827   :  { %v2256_v29 = vpop.eup %2255 }
 0x828   :  { %v1055_v31 = vsel %vm229_vm2, %v2256_v29, 0.0  ;;  %v1298_v44 = vpop.permute.xlu1 %1297 }
 0x829   :  { %1056 = vadd.xlane.f32.xlu0 %v1055_v31 }
 0x82b   :  { %v2258_v45 = vpop.eup %2257 }
 0x82c   :  { %v1058_v33 = vsel %vm229_vm2, %v2258_v45, 0.0  ;;  %v1296_v47 = vpop.permute.xlu1 %1295 }
 0x82d   :  { %1059 = vadd.xlane.f32.xlu0 %v1058_v33 }
 0x843   :  { %1217 = vrot.lane.b32.xlu0 %v2452_v43, %s2315_s19 }
 0x8b6   :  { %v1057_v34 = vpop.xlane.xlu0 %1056 }
 0x8b7   :  { %2259 = vrcp.f32 %v1057_v34 }
 0x8ba   :  { %v1060_v35 = vpop.xlane.xlu0 %1059 }
 0x8bb   :  { %2261 = vrcp.f32 %v1060_v35 }
 0x8be   :  { %v1218_v43 = vpop.permute.xlu0 %1217 }
 0x8c1   :  { %v2260_v38 = vpop.eup %2259 }
 0x8c2   :  { %v1063_v40 = vmul.f32 %v2260_v38, %v2256_v29 }
 0x8c4   :  { %2108 = vmatmul.mubr.msk.f32.vlgmr.msra.gmra.mrb[8].mxu0 %vm229_vm2, %v1063_v40 }
 0x8c5   :  { %v2262_v42 = vpop.eup %2261  ;;  %2116 = vmatpush3.xpose.msk.msra.mxu0 %vm229_vm2, %v1220_v37  ;;  %2117 = vmatprep.mubr.msk.f32.mxu0 %vm2304_vm1, %v2303_v36  ;;  %v1973_v37 = vld [vmem:[%s2696_s7] ss:$0 sm:$0xff] }
 0x8c6   :  { %v1064_v46 = vmul.f32 %v2262_v42, %v2258_v45  ;;  %2125 = vmatprep.subr.mxu0 %v2303_v36 }
 0x8c8   :  { %2113 = vmatmul.mubr.msk.f32.vlgmr.msra.gmra.mrb[14].mxu1 %vm229_vm2, %v1064_v46  ;;  %2118 = vmatmul.mubr.msk.f32.vlgmr.msra.gmra.mrb[10].mxu0 %vm229_vm2, %v1218_v43 }
 0x8c9   :  { %2121 = vmatpush3.xpose.msk.msra.mxu1 %vm229_vm2, %v1298_v44  ;;  %2122 = vmatprep.mubr.msk.f32.mxu1 %vm2304_vm1, %v2303_v36 }
 0x8ca   :  { %2130 = vmatprep.subr.mxu1 %v2303_v36  ;;  %2127 = vmatprep.mubr.msk.f32.mxu0 %vm2304_vm1, %v2303_v36 }
 0x8cc   :  { %2123 = vmatmul.mubr.msk.f32.vlgmr.msra.gmra.mrb[16].mxu1 %vm229_vm2, %v1296_v47 }
 0x8cd   :  { %2132 = vmatprep.mubr.msk.f32.mxu1 %vm2304_vm1, %v2303_v36 }
 0x997   :  { %v1137_v48 = vpop.f32.mrb[8].mxu0 }
 0x998   :  { %v2109_v49 = vpop.f32.mrb[9].mxu0 }
 0x99b   :  { %v1213_v50 = vpop.f32.mrb[14].mxu1  ;;  %v1291_v51 = vpop.f32.mrb[10].mxu0 }
 0x99c   :  { %v1292_v52 = vadd.f32 %v1291_v51, %v2471_v59  ;;  %v2114_v53 = vpop.f32.mrb[15].mxu1  ;;  %v2119_v54 = vpop.f32.mrb[11].mxu0 }
 0x99e   :  { %v1373_v55 = vsel %vm229_vm2, %v1292_v52, -inf }
 0x99f   :  { %1374 = vmax.xlane.f32.xlu0 %v1373_v55  ;;  %v1369_v56 = vpop.f32.mrb[16].mxu1  ;;  %v1717_v55 = vld [vmem:[%s2699_s10] sm:$0xff] }
 0x9a0   :  { %v1370_v57 = vadd.f32 %v1369_v56, %v2474_v2  ;;  %v2124_v58 = vpop.f32.mrb[17].mxu1  ;;  %v1718_v56 = vld [vmem:[%s2699_s10 + $0x8] sm:$0xff] }
 0x9a1   :  { %v1719_v58 = vld [vmem:[%s2699_s10 + $0x10] sm:$0xff] }
 0x9a2   :  { %v1376_v60 = vsel %vm229_vm2, %v1370_v57, -inf }
 0x9a3   :  { %1377 = vmax.xlane.f32.xlu1 %v1376_v60  ;;  %v1720_v60 = vld [vmem:[%s2699_s10 + $0x18] sm:$0xff] }
 0x9b4   :  { %1471 = vrot.lane.b32.xlu1 %v2444_v39, %s2316_s20 }
 0x9b8   :  { %1549 = vrot.lane.b32.xlu1 %v2539_v9, %s2317_s21 }
 0x9bc   :  { %1551 = vrot.lane.b32.xlu1 %v2541_v11, %s2317_s21 }
 0x9c0   :  { %1559 = vrot.lane.b32.xlu1 %v1213_v50, %s2318_s22 }
 0xa2c   :  { %v1375_v36 = vpop.xlane.xlu0 %1374 }
 0xa2d   :  { %v1379_v59 = vsub.f32 %v1292_v52, %v1375_v36  ;;  %v2196_v36 = vpack.c.bf16 %v1720_v60, %v1719_v58 }
 0xa2f   :  { %v1381_v61 = vmul.f32 1.442695, %v1379_v59 }
 0xa30   :  { %v1378_v2 = vpop.xlane.xlu1 %1377 }
 0xa31   :  { %2263 = vpow2.f32 %v1381_v61  ;;  %v1380_v62 = vsub.f32 %v1370_v57, %v1378_v2  ;;  %v2192_v57 = vpack.c.bf16 %v1718_v56, %v1717_v55 }
 0xa33   :  { %v1383_v63 = vmul.f32 1.442695, %v1380_v62 }
 0xa34   :  { %v1472_v3 = vpop.permute.xlu1 %1471 }
 0xa35   :  { %2265 = vpow2.f32 %v1383_v63  ;;  %2131 = vmatpush3.msra.mxu1 %v1472_v3 }
 0xa36   :  { %2193 = vmatprep.subr.bf16.mxu1 %v2192_v57 }
 0xa38   :  { %v1550_v23 = vpop.permute.xlu1 %1549 }
 0xa39   :  { %v1571_v26 = vsel %vm229_vm2, %v2505_v30, %v1550_v23 }
 0xa3b   :  { %v2264_v39 = vpop.eup %2263 }
 0xa3c   :  { %v1385_v4 = vsel %vm229_vm2, %v2264_v39, 0.0  ;;  %v1552_v24 = vpop.permute.xlu1 %1551 }
 0xa3d   :  { %1386 = vadd.xlane.f32.xlu0 %v1385_v4  ;;  %v1572_v45 = vsel %vm229_vm2, %v2507_v32, %v1552_v24  ;;  %v1976_v4 = vld [vmem:[%s2697_s8] ss:$0 sm:$0xff] }
 0xa3e   :  { %v1978_v24 = vld [vmem:[%s2700_s11] ss:$0 sm:$0xff] }
 0xa3f   :  { %v2266_v5 = vpop.eup %2265 }
 0xa40   :  { %v1388_v6 = vsel %vm229_vm2, %v2266_v5, 0.0  ;;  %v1560_v27 = vpop.permute.xlu1 %1559 }
 0xa41   :  { %1389 = vadd.xlane.f32.xlu0 %v1388_v6  ;;  %v1575_v33 = vsel %vm1573_vm4, %v1572_v45, %v1560_v27  ;;  %v1977_v6 = vld [vmem:[%s2698_s9] ss:$0 sm:$0xff] }
 0xa57   :  { %1395 = vrot.lane.b32.xlu0 %v2446_v41, %s2316_s20  ;;  %v1580_v41 = vld [vmem:[%s2695_s6 + $0x8] sm:$0xff] }
 0xa58   :  { %v2184_v15 = vpack.c.bf16 %v1580_v41, %v1579_v14  ;;  %v1828_v14 = vld [vmem:[%s2701_s12 + $0x8] sm:$0xff] }
 0xa5b   :  { %1557 = vrot.lane.b32.xlu0 %v1137_v48, %s2318_s22 }
 0xaca   :  { %v1387_v7 = vpop.xlane.xlu0 %1386 }
 0xacb   :  { %2267 = vrcp.f32 %v1387_v7 }
 0xace   :  { %v1390_v8 = vpop.xlane.xlu0 %1389 }
 0xacf   :  { %2269 = vrcp.f32 %v1390_v8 }
 0xad2   :  { %v1396_v9 = vpop.permute.xlu0 %1395 }
 0xad3   :  { %2126 = vmatpush3.msra.mxu0 %v1396_v9 }
 0xad4   :  { %2185 = vmatprep.subr.bf16.mxu0 %v2184_v15 }
 0xad5   :  { %v2268_v10 = vpop.eup %2267 }
 0xad6   :  { %v1393_v11 = vmul.f32 %v2268_v10, %v2264_v39  ;;  %v1558_v25 = vpop.permute.xlu0 %1557 }
 0xad7   :  { %v1574_v28 = vsel %vm1573_vm4, %v1571_v26, %v1558_v25 }
 0xad8   :  { %2128 = vmatmul.mubr.msk.f32.vlgmr.msra.gmra.mrb[12].mxu0 %vm229_vm2, %v1393_v11 }
 0xad9   :  { %v2270_v12 = vpop.eup %2269  ;;  %2187 = vmatpush3.bf16.msra.mxu0 %v2184_v15  ;;  %v1829_v15 = vld [vmem:[%s2701_s12 + $0x10] sm:$0xff] }
 0xada   :  { %v1394_v13 = vmul.f32 %v2270_v12, %v2266_v5  ;;  %2189 = vmatprep.subr.bf16.mxu0 %v2188_v18  ;;  %v2204_v17 = vpack.c.bf16 %v1830_v16, %v1829_v15 }
 0xadc   :  { %2133 = vmatmul.mubr.msk.f32.vlgmr.msra.gmra.mrb[18].mxu1 %vm229_vm2, %v1394_v13  ;;  %v1827_v13 = vld [vmem:[%s2701_s12] sm:$0xff] }
 0xadd   :  { %2191 = vmatpush3.bf16.msra.mxu0 %v2188_v18  ;;  %2195 = vmatpush3.bf16.msra.mxu1 %v2192_v57  ;;  %v2200_v41 = vpack.c.bf16 %v1828_v14, %v1827_v13  ;;  %v1831_v18 = vld [vmem:[%s2701_s12 + $0x20] sm:$0xff] }
 0xade   :  { %2197 = vmatprep.subr.bf16.mxu1 %v2196_v36 }
 0xadf   :  { %2201 = vmatprep.subr.bf16.mxu0 %v2200_v41 }
 0xae1   :  { %2199 = vmatpush3.bf16.msra.mxu1 %v2196_v36 }
 0xbab   :  { %v1467_v19 = vpop.f32.mrb[12].mxu0 }
 0xbac   :  { %1565 = vrot.lane.b32.xlu0 %v1467_v19, %s2319_s5  ;;  %v2129_v20 = vpop.f32.mrb[13].mxu0  ;;  %v1832_v19 = vld [vmem:[%s2701_s12 + $0x28] sm:$0xff] }
 0xbad   :  { %v2208_v20 = vpack.c.bf16 %v1832_v19, %v1831_v18 }
 0xbaf   :  { %v1543_v21 = vpop.f32.mrb[18].mxu1 }
 0xbb0   :  { %1567 = vrot.lane.b32.xlu1 %v1543_v21, %s2319_s5  ;;  %v2134_v22 = vpop.f32.mrb[19].mxu1  ;;  %v1833_v21 = vld [vmem:[%s2701_s12 + $0x30] sm:$0xff] }
 0xbb1   :  { %v1834_v22 = vld [vmem:[%s2701_s12 + $0x38] sm:$0xff] }
 0xbb2   :  { %v2212_v23 = vpack.c.bf16 %v1834_v22, %v1833_v21 }
 0xc1e   :  { %v1566_v29 = vpop.permute.xlu0 %1565 }
 0xc1f   :  { %v1577_v31 = vsel %vm1576_vm3, %v1574_v28, %v1566_v29 }
 0xc20   :  { %2143 = vmatprep.mubr.msk.f32.mxu0 %vm55_vm0, %v1577_v31 }
 0xc22   :  { %v1568_v34 = vpop.permute.xlu1 %1567 }
 0xc23   :  { %v1578_v35 = vsel %vm1576_vm3, %v1575_v33, %v1568_v34 }
 0xc24   :  { %2144 = vmatmul.mubr.msk.f32.vlgmr.msra.gmra.mrb[14].mxu0 %vm55_vm0, %v1578_v35 }
 0xc25   :  { %2203 = vmatpush3.bf16.msra.mxu0 %v2200_v41 }
 0xc26   :  { %2205 = vmatprep.subr.bf16.mxu0 %v2204_v17 }
 0xc29   :  { %2207 = vmatpush3.bf16.msra.mxu0 %v2204_v17 }
 0xc2a   :  { %2209 = vmatprep.subr.bf16.mxu0 %v2208_v20 }
 0xc2d   :  { %2211 = vmatpush3.bf16.msra.mxu0 %v2208_v20 }
 0xc2e   :  { %2213 = vmatprep.subr.bf16.mxu0 %v2212_v23 }
 0xc31   :  { %2215 = vmatpush3.bf16.msra.mxu0 %v2212_v23 }
 0xcf7   :  { %v2145_v30 = vpop.f32.mrb[14].mxu0 }
 0xcf8   :  { %v1668_v38 = vadd.f32 %v2145_v30, %v1973_v37  ;;  %v1662_v40 = vpop.f32.mrb[15].mxu0 }
 0xcf9   :  { %v1663_v42 = vadd.f32 %v1973_v37, %v1662_v40 }
 0xcfa   :  { %v2609_v44 = vadd.f32 %v1668_v38, %v2405_v1 }
 0xcfb   :  { %v2612_v46 = vadd.f32 %v1663_v42, %v2400_v0 }
 0xcfc   :  { %v1678_v32 = vsel %vm55_vm0, %v2609_v44, 0.0 }
 0xcfd   :  { %1679 = vadd.xlane.f32.xlu1 %v1678_v32  ;;  %v1675_v43 = vsel %vm55_vm0, %v2612_v46, 0.0 }
 0xcfe   :  { %1676 = vadd.xlane.f32.xlu0 %v1675_v43 }
 0xd8a   :  { %v1680_v47 = vpop.xlane.xlu1 %1679 }
 0xd8b   :  { %v1682_v48 = vmul.f32 0.03125, %v1680_v47  ;;  %v1677_v49 = vpop.xlane.xlu0 %1676 }
 0xd8c   :  { %v1681_v50 = vmul.f32 0.03125, %v1677_v49 }
 0xd8d   :  { %v1684_v51 = vsub.f32 %v2609_v44, %v1682_v48 }
 0xd8e   :  { %v1683_v1 = vsub.f32 %v2612_v46, %v1681_v50 }
 0xd8f   :  { %v1686_v53 = vmul.f32 %v1684_v51, %v1684_v51 }
 0xd90   :  { %v1685_v52 = vmul.f32 %v1683_v1, %v1683_v1 }
 0xd91   :  { %v1690_v54 = vsel %vm55_vm0, %v1686_v53, 0.0 }
 0xd92   :  { %v1687_v0 = vsel %vm55_vm0, %v1685_v52, 0.0 }
 0xd93   :  { %1688 = vadd.xlane.f32.xlu0 %v1687_v0 }
 0xd97   :  { %1691 = vadd.xlane.f32.xlu0 %v1690_v54 }
 0xe20   :  { %v1689_v59 = vpop.xlane.xlu0 %1688 }
 0xe21   :  { %v1693_v61 = vmul.f32 0.03125, %v1689_v59 }
 0xe23   :  { %v1695_v2 = vadd.f32 1e-12, %v1693_v61 }
 0xe24   :  { %v1692_v62 = vpop.xlane.xlu0 %1691 }
 0xe25   :  { %2271 = vrsqrt.f32 %v1695_v2  ;;  %v1694_v63 = vmul.f32 0.03125, %v1692_v62 }
 0xe27   :  { %v1696_v3 = vadd.f32 1e-12, %v1694_v63 }
 0xe29   :  { %2273 = vrsqrt.f32 %v1696_v3 }
 0xe2f   :  { %v2272_v39 = vpop.eup %2271 }
 0xe30   :  { %v1699_v5 = vmul.f32 %v2272_v39, %v1683_v1  ;;  %v1981_v1 = vld [vmem:[%s2702_s13] ss:$0 sm:$0xff] }
 0xe32   :  { %v1707_v7 = vmul.f32 %v1976_v4, %v1699_v5 }
 0xe33   :  { %v2274_v8 = vpop.eup %2273 }
 0xe34   :  { %v1700_v9 = vmul.f32 %v2274_v8, %v1684_v51  ;;  %v1715_v10 = vadd.f32 %v1977_v6, %v1707_v7 }
 0xe36   :  { %v1708_v11 = vmul.f32 %v1976_v4, %v1700_v9  ;;  %2154 = vmatprep.mubr.msk.f32.mxu1 %vm55_vm0, %v1715_v10 }
 0xe38   :  { %v1716_v12 = vadd.f32 %v1977_v6, %v1708_v11 }
 0xe3a   :  { %2155 = vmatmul.mubr.msk.f32.vlgmr.msra.gmra.mrb[20].mxu1 %vm55_vm0, %v1716_v12 }
 0xf0d   :  { %v2156_v25 = vpop.f32.mrb[20].mxu1 }
 0xf0e   :  { %v1806_v26 = vadd.f32 %v2156_v25, %v1978_v24  ;;  %v1800_v27 = vpop.f32.mrb[21].mxu1 }
 0xf0f   :  { %v1801_v28 = vadd.f32 %v1978_v24, %v1800_v27 }
 0xf10   :  { %v1812_v29 = vmul.f32 0.044715, %v1806_v26  ;;  %v1810_v49 = vmul.f32 0.5, %v1806_v26 }
 0xf11   :  { %v1811_v31 = vmul.f32 0.044715, %v1801_v28  ;;  %v1809_v47 = vmul.f32 0.5, %v1801_v28 }
 0xf12   :  { %v1814_v45 = vmul.f32 %v1812_v29, %v1806_v26 }
 0xf13   :  { %v1813_v33 = vmul.f32 %v1811_v31, %v1801_v28 }
 0xf14   :  { %v1816_v34 = vmul.f32 %v1814_v45, %v1806_v26 }
 0xf15   :  { %v1815_v35 = vmul.f32 %v1813_v33, %v1801_v28 }
 0xf16   :  { %v1818_v37 = vadd.f32 %v1816_v34, %v1806_v26 }
 0xf17   :  { %v1817_v30 = vadd.f32 %v1815_v35, %v1801_v28 }
 0xf18   :  { %v1820_v38 = vmul.f32 0.7978846, %v1818_v37 }
 0xf19   :  { %v1819_v40 = vmul.f32 0.7978846, %v1817_v30 }
 0xf1a   :  { %2275 = vtanh.f32 %v1820_v38 }
 0xf1b   :  { %2277 = vtanh.f32 %v1819_v40 }
 0xf24   :  { %v2276_v42 = vpop.eup %2275 }
 0xf25   :  { %v2278_v32 = vpop.eup %2277  ;;  %v1824_v43 = vadd.f32 1.0, %v2276_v42 }
 0xf26   :  { %v1823_v48 = vadd.f32 1.0, %v2278_v32 }
 0xf27   :  { %v1826_v51 = vmul.f32 %v1824_v43, %v1810_v49 }
 0xf28   :  { %v1825_v50 = vmul.f32 %v1823_v48, %v1809_v47 }
 0xf2a   :  { %2173 = vmatprep.mubr.msk.f32.mxu0 %vm1842_vm5, %v1825_v50 }
 0xf2b   :  { %2174 = vmatmul.mubr.msk.f32.vlgmr.msra.gmra.mrb[16].mxu0 %vm1842_vm5, %v1826_v51 }
 0xffe   :  { %v2175_v52 = vpop.f32.mrb[16].mxu0 }
 0xfff   :  { %v1921_v0 = vadd.f32 %v2175_v52, %v1981_v1  ;;  %v1915_v53 = vpop.f32.mrb[17].mxu0 }
0x1000   :  { %v1916_v54 = vadd.f32 %v1981_v1, %v1915_v53 }
0x1001   :  { %v1925_v55 = vadd.f32 %v1921_v0, %v2609_v44 }
0x1002   :  { %v1924_v56 = vadd.f32 %v1916_v54, %v2612_v46 }
0x1003   :  { %1927 = vst.msk [vmem:[#allocation2 + $0x8] sm:$0xff] %vm55_vm0, %v1925_v55 }
0x1004   :  { %1926 = vst.msk [vmem:[#allocation2] sm:$0xff] %vm55_vm0, %v1924_v56 }
0x1005   :  { %2290 = shalt.err (!%p2287_p4)
}
0x1006   :  { %s2291_s18 = scalar_lea.hbm %s2703_s14, 256 }
0x1007   :  { %p2292_p5 = scmp.ne.s32.totalorder %s2703_s14, %s2291_s18  ;;  %p2295_p6 = scmp.lt.u32.totalorder %s2291_s18, %s2703_s14 }
0x1009   :  { %p2297_p7 = pnand %p2295_p6, %p2292_p5 }
0x100b   :  { %2300 = shalt.err (!%p2297_p7)
}
0x100c   :  { %s2321_s23 = smov 128  }
0x100d   :  { %1939 = dma.vmem_to_hbm [thread:$0]  %s1934_s16, 256, %s2703_s14, [#allocation3], %s2321_s23, %s2321_s23, %s2317_s21  }
0x100e   :  { %2301 = dma.done.wait [#allocation3], 256  }
0x100f   :  { %2302 = vsyncadd [#allocation3], 4294967040 }
0x1010   :  { %1943 = vsyncpa [#allocation3], 1 }

</bundles_post_ra>
